<compile_context>
chip_gen: v5e
topology: v5e:2x2
jax: 0.10.0
libtpu: 0.0.40
codegen_flags: <defaults>
</compile_context>

<pallas_src>
import functools

import jax
import jax.numpy as jnp
from jax.experimental import pallas as pl
from jax.experimental.pallas import tpu as pltpu

EPS = 1e-5
LANE = 128


def _round_up(x, m):
    return (x + m - 1) // m * m


def _vmem_limit_bytes():
    """Generation-aware VMEM cap: ~3/4 of physical VMEM (64 MiB on v7x,
    128 MiB on v5e/v6e), with a v7x-safe fallback if the query fails."""
    try:
        cap = int(pltpu.get_tpu_info().vmem_capacity_bytes)
    except Exception:
        cap = 64 * 1024 * 1024
    return max(32 * 1024 * 1024, min(cap * 3 // 4, 100 * 1024 * 1024))


def _max_tile_rows(in_p, out_p, x_bytes, budget_bytes):
    """Footprint-based bound on the batch-tile height for the stats/h2 kernel
    (the heavier of the two calls)."""
    per_row = (2 * in_p * x_bytes      # x tile, double-buffered
               + 2 * in_p              # bf16 copy of the x tile
               + 16 * out_p            # h1 / a1 / h2 / elementwise f32 temps
               + 2 * out_p             # a1 bf16 MXU operand
               + 8 * out_p)            # h2 output tile, double-buffered (f32)
    resident = ((in_p + out_p) * out_p * 2   # w1 + w2 bf16, resident across tiles
                + 16 * out_p * 4)            # BN params + stats scratch
    return max(8, (budget_bytes - resident) // per_row)


def _choose_tile_n(n, max_rows):
    n8 = _round_up(max(n, 8), 8)
    if n8 <= max_rows:
        return n8                      # whole batch fits in one tile
    for t in (1024, 512, 256):         # multiples of 256 fill v6e/v7x's 256-row MXU
        if t <= max_rows:
            return t
    return max(8, (max_rows // 8) * 8)


# ---------------------------------------------------------------------------
# Kernel 1: grid (pass, batch-tile).
#   pass 0: h1 = x @ w1, accumulate BN1 sum / sumsq  -> folded scale1/shift1
#   pass 1: recompute h1, a1 = relu(bn1(h1)), h2 = a1 @ w2, write h2,
#           accumulate BN2 sum / sumsq               -> folded scale2/shift2
# ---------------------------------------------------------------------------
def _stats_h2_kernel(n_real, tile_n, needs_row_mask,
                     x_ref, w1_ref, w2_ref, g1_ref, b1_ref, g2_ref, b2_ref,
                     h2_ref, sc2_ref, sh2_ref,
                     s1_ref, ss1_ref, sc1_ref, sh1_ref, s2_ref, ss2_ref):
    p = pl.program_id(0)       # pass index
    i = pl.program_id(1)       # batch-tile index
    nt = pl.num_programs(1)
    inv_n = jnp.float32(1.0 / n_real)

    @pl.when(jnp.logical_and(p == 0, i == 0))
    def _init():
        for r in (s1_ref, ss1_ref, s2_ref, ss2_ref):
            r[...] = jnp.zeros_like(r)

    # linear1 on the MXU (bf16 operands, f32 accumulation).  Recomputed in
    # pass 1 instead of round-tripping an [N, out_p] f32 h1 through HBM.
    x_bf16 = x_ref[...].astype(jnp.bfloat16)
    h1 = jnp.dot(x_bf16, w1_ref[...], preferred_element_type=jnp.float32)

    @pl.when(p == 0)
    def _bn1_stats():
        # One-pass sums on the VPU/XLU (keeps vmatmul slots free for the
        # production matmuls).  Zero-padded x rows contribute exactly 0.
        s1_ref[...] += jnp.sum(h1, axis=0, keepdims=True)
        ss1_ref[...] += jnp.sum(h1 * h1, axis=0, keepdims=True)

        @pl.when(i == nt - 1)
        def _finalize_bn1():
            mean = s1_ref[...] * inv_n
            var = jnp.maximum(ss1_ref[...] * inv_n - mean * mean, 0.0)
            scale = g1_ref[...] * jax.lax.rsqrt(var + EPS)
            sc1_ref[...] = scale
            sh1_ref[...] = b1_ref[...] - mean * scale

    @pl.when(p == 1)
    def _h2_and_bn2_stats():
        a1 = jnp.maximum(h1 * sc1_ref[...] + sh1_ref[...], 0.0)
        if needs_row_mask:
            # Only the final tile holds padded rows; zero them so they do not
            # pollute the BN2 statistics (bn1's shift makes them non-zero).
            row = i * tile_n + jax.lax.broadcasted_iota(jnp.int32, (tile_n, 1), 0)
            a1 = jnp.where(row < n_real, a1, 0.0)
        h2 = jnp.dot(a1.astype(jnp.bfloat16), w2_ref[...],
                     preferred_element_type=jnp.float32)
        h2_ref[...] = h2
        s2_ref[...] += jnp.sum(h2, axis=0, keepdims=True)
        ss2_ref[...] += jnp.sum(h2 * h2, axis=0, keepdims=True)

        @pl.when(i == nt - 1)
        def _finalize_bn2():
            mean = s2_ref[...] * inv_n
            var = jnp.maximum(ss2_ref[...] * inv_n - mean * mean, 0.0)
            scale = g2_ref[...] * jax.lax.rsqrt(var + EPS)
            sc2_ref[...] = scale
            sh2_ref[...] = b2_ref[...] - mean * scale


# ---------------------------------------------------------------------------
# Kernel 2: per-tile finalize, out = relu(bn2(h2) + identity).
# ---------------------------------------------------------------------------
def _finalize_kernel(has_downsample, *refs):
    if has_downsample:
        h2_ref, x_ref, wd_ref, sc2_ref, sh2_ref, o_ref = refs
        identity = jnp.dot(x_ref[...], wd_ref[...],
                           preferred_element_type=jnp.float32)
    else:
        h2_ref, x_ref, sc2_ref, sh2_ref, o_ref = refs
        identity = x_ref[...].astype(jnp.float32)   # residual stays f32
    out = h2_ref[...] * sc2_ref[...] + sh2_ref[...] + identity
    o_ref[...] = jnp.maximum(out, 0.0).astype(o_ref.dtype)


# ---------------------------------------------------------------------------
# One-time parameter preparation (module init, not per forward call)
# ---------------------------------------------------------------------------
def prepare_mlp_params(w1, w2, wd, g1, b1, g2, b2):
    """Transpose weights to [F_in, F_out], pad feature dims to multiples of
    128 (lane width), cast matmul operands to bf16 and reshape BN affine
    params to [1, F].  Padded gamma/beta lanes MUST stay exactly zero so the
    padded feature lanes remain 0 through BN (scale = 0 * rsqrt(0+eps))."""
    out_f, in_f = w1.shape
    in_p = _round_up(in_f, LANE)
    out_p = _round_up(out_f, LANE)

    def prep_w(w, rows_p, cols_p):
        wt = jnp.transpose(w).astype(jnp.float32)
        wt = jnp.pad(wt, ((0, rows_p - wt.shape[0]), (0, cols_p - wt.shape[1])))
        return wt.astype(jnp.bfloat16)

    def prep_vec(v):
        v = v.astype(jnp.float32)
        return jnp.pad(v, (0, out_p - v.shape[0])).reshape(1, out_p)

    return dict(
        in_f=in_f, out_f=out_f, in_p=in_p, out_p=out_p,
        w1=prep_w(w1, in_p, out_p),
        w2=prep_w(w2, out_p, out_p),
        wd=prep_w(wd, in_p, out_p) if wd is not None else None,
        g1=prep_vec(g1), b1=prep_vec(b1),
        g2=prep_vec(g2), b2=prep_vec(b2),
    )


# ---------------------------------------------------------------------------
# Forward wrapper
# ---------------------------------------------------------------------------
def mlp_block(x, params, tile_n=None):
    """x: [N, in_features] float32; params: output of prepare_mlp_params."""
    n, in_f = x.shape
    assert in_f == params["in_f"], "feature-dim mismatch"
    in_p, out_p, out_f = params["in_p"], params["out_p"], params["out_f"]
    has_downsample = params["wd"] is not None
    if not has_downsample:
        assert in_f == out_f and in_p == out_p, "identity skip needs in_f == out_f"

    # Downsample path: x only feeds MXU matmuls -> ship it in bf16 (halves the
    # x DMA bytes).  Identity path: keep f32 so the residual add is f32.
    x_dtype = jnp.bfloat16 if has_downsample else jnp.float32
    x_bytes = 2 if has_downsample else 4

    vmem_limit = _vmem_limit_bytes()
    if tile_n is None:
        tile_n = _choose_tile_n(n, _max_tile_rows(in_p, out_p, x_bytes,
                                                  int(vmem_limit * 0.8)))
    tile_n = max(8, _round_up(int(tile_n), 8))
    tile_n = min(tile_n, _round_up(max(n, 8), 8))
    nt = -(-n // tile_n)
    n_pad = nt * tile_n
    pad_rows = n_pad - n
    pad_cols = in_p - in_f

    # Skip the pad (an extra HBM pass over the activations) when nothing needs
    # padding; likewise the output slice below.
    if pad_rows or pad_cols:
        x_in = jnp.pad(x.astype(x_dtype), ((0, pad_rows), (0, pad_cols)))
    elif x_dtype != x.dtype:
        x_in = x.astype(x_dtype)
    else:
        x_in = x

    cparams1 = pltpu.CompilerParams(
        # batch-tile axis must stay sequential: BN stats accumulate in shared
        # VMEM scratch.  (TODO(synk): per-core partial stats for megacore.)
        dimension_semantics=("arbitrary", "arbitrary"),
        vmem_limit_bytes=int(vmem_limit))
    cparams2 = pltpu.CompilerParams(
        dimension_semantics=("parallel",),      # shards across v7x's 2 TCs
        vmem_limit_bytes=int(vmem_limit))

    k1 = functools.partial(_stats_h2_kernel, n, tile_n, pad_rows > 0)
    # Weight / BN-param specs use constant index maps -> DMA'd once, resident
    # across all batch tiles.  x / h2 specs keep the default Buffered(2).
    h2, sc2, sh2 = pl.pallas_call(
        k1,
        grid=(2, nt),
        in_specs=[
            pl.BlockSpec((tile_n, in_p), lambda p, i: (i, 0)),   # x
            pl.BlockSpec((in_p, out_p), lambda p, i: (0, 0)),    # w1 (resident)
            pl.BlockSpec((out_p, out_p), lambda p, i: (0, 0)),   # w2 (resident)
            pl.BlockSpec((1, out_p), lambda p, i: (0, 0)),       # gamma1
            pl.BlockSpec((1, out_p), lambda p, i: (0, 0)),       # beta1
            pl.BlockSpec((1, out_p), lambda p, i: (0, 0)),       # gamma2
            pl.BlockSpec((1, out_p), lambda p, i: (0, 0)),       # beta2
        ],
        out_specs=(
            # h2 tiles are only produced in pass 1; during pass 0 the index
            # stays pinned at block 0 so no spurious writebacks are issued.
            pl.BlockSpec((tile_n, out_p), lambda p, i: (p * i, 0)),
            pl.BlockSpec((1, out_p), lambda p, i: (0, 0)),        # bn2 scale
            pl.BlockSpec((1, out_p), lambda p, i: (0, 0)),        # bn2 shift
        ),
        out_shape=(
            jax.ShapeDtypeStruct((n_pad, out_p), jnp.float32),
            jax.ShapeDtypeStruct((1, out_p), jnp.float32),
            jax.ShapeDtypeStruct((1, out_p), jnp.float32),
        ),
        scratch_shapes=[pltpu.VMEM((1, out_p), jnp.float32)] * 6,
        compiler_params=cparams1,
    )(x_in, params["w1"], params["w2"], params["g1"], params["b1"],
      params["g2"], params["b2"])

    in_specs2 = [
        pl.BlockSpec((tile_n, out_p), lambda i: (i, 0)),   # h2
        pl.BlockSpec((tile_n, in_p), lambda i: (i, 0)),    # x (residual source)
    ]
    args2 = [h2, x_in]
    if has_downsample:
        in_specs2.append(pl.BlockSpec((in_p, out_p), lambda i: (0, 0)))
        args2.append(params["wd"])
    in_specs2 += [pl.BlockSpec((1, out_p), lambda i: (0, 0)),
                  pl.BlockSpec((1, out_p), lambda i: (0, 0))]
    args2 += [sc2, sh2]

    out_pad = pl.pallas_call(
        functools.partial(_finalize_kernel, has_downsample),
        grid=(nt,),
        in_specs=in_specs2,
        out_specs=pl.BlockSpec((tile_n, out_p), lambda i: (i, 0)),
        out_shape=jax.ShapeDtypeStruct((n_pad, out_p), x.dtype),
        compiler_params=cparams2,
    )(*args2)

    if n_pad > n or out_p > out_f:
        return out_pad[:n, :out_f]
    return out_pad


# ---------------------------------------------------------------------------
# Pure-JAX references
# ---------------------------------------------------------------------------
def _bn_ref(h, g, b):
    mean = jnp.mean(h, axis=0, keepdims=True)
    var = jnp.mean((h - mean) ** 2, axis=0, keepdims=True)
    scale = g[None, :] * jax.lax.rsqrt(var + EPS)
    shift = b[None, :] - mean * scale
    return h * scale + shift


def mlp_block_ref_f32(x, w1, w2, wd, g1, b1, g2, b2):
    """Pure-f32 reference mirroring the PyTorch training-mode forward."""
    xf = x.astype(jnp.float32)
    h = xf @ w1.T
    a1 = jnp.maximum(_bn_ref(h, g1, b1), 0.0)
    h2 = a1 @ w2.T
    h2 = _bn_ref(h2, g2, b2)
    identity = xf @ wd.T if wd is not None else xf
    return jnp.maximum(h2 + identity, 0.0).astype(x.dtype)


def mlp_block_ref_mixed(x, w1, w2, wd, g1, b1, g2, b2):
    """Reference mirroring the kernel's bf16-operand / f32-accumulate matmuls."""
    xf = x.astype(jnp.float32)
    xb = xf.astype(jnp.bfloat16)

    def mm(a, w):
        return jnp.dot(a, w.T.astype(jnp.bfloat16),
                       preferred_element_type=jnp.float32)

    h = mm(xb, w1)
    a1 = jnp.maximum(_bn_ref(h, g1, b1), 0.0)
    h2 = mm(a1.astype(jnp.bfloat16), w2)
    h2 = _bn_ref(h2, g2, b2)
    identity = mm(xb, wd) if wd is not None else xf
    return jnp.maximum(h2 + identity, 0.0).astype(x.dtype)


if __name__ == "__main__":
    def run_case(n, in_f, out_f, tile_n, key):
        kx, k1, k2, kd, kg1, kb1, kg2, kb2 = jax.random.split(key, 8)
        x = jax.random.normal(kx, (n, in_f), dtype=jnp.float32)
        w1 = jax.random.normal(k1, (out_f, in_f), dtype=jnp.float32) * 0.1
        w2 = jax.random.normal(k2, (out_f, out_f), dtype=jnp.float32) * 0.1
        wd = (jax.random.normal(kd, (out_f, in_f), dtype=jnp.float32) * 0.1
              if in_f != out_f else None)
        g1 = 1.0 + 0.1 * jax.random.normal(kg1, (out_f,), dtype=jnp.float32)
        b1 = 0.1 * jax.random.normal(kb1, (out_f,), dtype=jnp.float32)
        g2 = 1.0 + 0.1 * jax.random.normal(kg2, (out_f,), dtype=jnp.float32)
        b2 = 0.1 * jax.random.normal(kb2, (out_f,), dtype=jnp.float32)

        params = prepare_mlp_params(w1, w2, wd, g1, b1, g2, b2)
        out = jax.block_until_ready(mlp_block(x, params, tile_n=tile_n))
        assert out.shape == (n, out_f)

        ref_mixed = mlp_block_ref_mixed(x, w1, w2, wd, g1, b1, g2, b2)
        ref_f32 = mlp_block_ref_f32(x, w1, w2, wd, g1, b1, g2, b2)
        assert jnp.allclose(out, ref_mixed, atol=5e-3, rtol=5e-3), \
            "mismatch vs bf16-operand / f32-accumulate reference"
        # bf16 matmul operands bound accuracy vs. the pure-f32 torch semantics.
        assert jnp.allclose(out, ref_f32, atol=1e-1, rtol=1e-1), \
            "mismatch vs f32 PyTorch-semantics reference"

    key = jax.random.PRNGKey(0)
    k_a, k_b = jax.random.split(key)
    # downsample path: multi-tile grid (nt=4), row padding/masking, feature
    # padding, bf16 x shipping.
    run_case(200, 48, 96, 64, k_a)
    # identity-skip path: auto tile size (single tile), lane-aligned features
    # (no pad / no slice), f32 residual.
    run_case(128, 128, 128, None, k_b)

    print("KERNEL_OK")
</pallas_src>

<mosaic_0001>
module attributes {stable_mosaic.version = 11 : i64} {
  func.func @_stats_h2_kernel(%arg0: i32, %arg1: i32, %arg2: memref<64x128xbf16, #tpu.memory_space<vmem>>, %arg3: memref<128x128xbf16, #tpu.memory_space<vmem>>, %arg4: memref<128x128xbf16, #tpu.memory_space<vmem>>, %arg5: memref<1x128xf32, #tpu.memory_space<vmem>>, %arg6: memref<1x128xf32, #tpu.memory_space<vmem>>, %arg7: memref<1x128xf32, #tpu.memory_space<vmem>>, %arg8: memref<1x128xf32, #tpu.memory_space<vmem>>, %arg9: memref<64x128xf32, #tpu.memory_space<vmem>>, %arg10: memref<1x128xf32, #tpu.memory_space<vmem>>, %arg11: memref<1x128xf32, #tpu.memory_space<vmem>>, %arg12: memref<1x128xf32, #tpu.memory_space<vmem>>, %arg13: memref<1x128xf32, #tpu.memory_space<vmem>>, %arg14: memref<1x128xf32, #tpu.memory_space<vmem>>, %arg15: memref<1x128xf32, #tpu.memory_space<vmem>>, %arg16: memref<1x128xf32, #tpu.memory_space<vmem>>, %arg17: memref<1x128xf32, #tpu.memory_space<vmem>>) attributes {dimension_semantics = [#tpu.dimension_semantics<arbitrary>, #tpu.dimension_semantics<arbitrary>], iteration_bounds = array<i64: 2, 4>, scalar_prefetch = 0 : i64, scratch_operands = 6 : i64, tpu.core_type = #tpu.core_type<tc>, window_params = [{transform_indices = @transform_0, window_bounds = array<i64: 64, 128>}, {pipeline_mode = #tpu.pipeline_mode<synchronous>, transform_indices = @transform_1, window_bounds = array<i64: 128, 128>}, {pipeline_mode = #tpu.pipeline_mode<synchronous>, transform_indices = @transform_2, window_bounds = array<i64: 128, 128>}, {pipeline_mode = #tpu.pipeline_mode<synchronous>, transform_indices = @transform_3, window_bounds = array<i64: 1, 128>}, {pipeline_mode = #tpu.pipeline_mode<synchronous>, transform_indices = @transform_4, window_bounds = array<i64: 1, 128>}, {pipeline_mode = #tpu.pipeline_mode<synchronous>, transform_indices = @transform_5, window_bounds = array<i64: 1, 128>}, {pipeline_mode = #tpu.pipeline_mode<synchronous>, transform_indices = @transform_6, window_bounds = array<i64: 1, 128>}, {transform_indices = @transform_7, window_bounds = array<i64: 64, 128>}, {pipeline_mode = #tpu.pipeline_mode<synchronous>, transform_indices = @transform_8, window_bounds = array<i64: 1, 128>}, {pipeline_mode = #tpu.pipeline_mode<synchronous>, transform_indices = @transform_9, window_bounds = array<i64: 1, 128>}]} {
    %c0_i32 = arith.constant 0 : i32
    %0 = arith.cmpi eq, %arg0, %c0_i32 : i32
    %c0_i32_0 = arith.constant 0 : i32
    %1 = arith.cmpi eq, %arg1, %c0_i32_0 : i32
    %2 = arith.andi %0, %1 : i1
    %3 = arith.extui %2 : i1 to i32
    %c0_i32_1 = arith.constant 0 : i32
    %4 = arith.cmpi ne, %3, %c0_i32_1 : i32
    scf.if %4 {
      %cst_10 = arith.constant 0.000000e+00 : f32
      %14 = vector.broadcast %cst_10 : f32 to vector<1x128xf32>
      %c0_11 = arith.constant 0 : index
      %c0_12 = arith.constant 0 : index
      %15 = vector.load %arg12[%c0_11, %c0_12] : memref<1x128xf32, #tpu.memory_space<vmem>>, vector<1x128xf32>
      tpu.vector_store %arg12[%c0_11, %c0_12], %14 {strides = array<i32>} : memref<1x128xf32, #tpu.memory_space<vmem>>, vector<1x128xf32>,
      %cst_13 = arith.constant 0.000000e+00 : f32
      %16 = vector.broadcast %cst_13 : f32 to vector<1x128xf32>
      %c0_14 = arith.constant 0 : index
      %c0_15 = arith.constant 0 : index
      %17 = vector.load %arg13[%c0_14, %c0_15] : memref<1x128xf32, #tpu.memory_space<vmem>>, vector<1x128xf32>
      tpu.vector_store %arg13[%c0_14, %c0_15], %16 {strides = array<i32>} : memref<1x128xf32, #tpu.memory_space<vmem>>, vector<1x128xf32>,
      %cst_16 = arith.constant 0.000000e+00 : f32
      %18 = vector.broadcast %cst_16 : f32 to vector<1x128xf32>
      %c0_17 = arith.constant 0 : index
      %c0_18 = arith.constant 0 : index
      %19 = vector.load %arg16[%c0_17, %c0_18] : memref<1x128xf32, #tpu.memory_space<vmem>>, vector<1x128xf32>
      tpu.vector_store %arg16[%c0_17, %c0_18], %18 {strides = array<i32>} : memref<1x128xf32, #tpu.memory_space<vmem>>, vector<1x128xf32>,
      %cst_19 = arith.constant 0.000000e+00 : f32
      %20 = vector.broadcast %cst_19 : f32 to vector<1x128xf32>
      %c0_20 = arith.constant 0 : index
      %c0_21 = arith.constant 0 : index
      %21 = vector.load %arg17[%c0_20, %c0_21] : memref<1x128xf32, #tpu.memory_space<vmem>>, vector<1x128xf32>
      tpu.vector_store %arg17[%c0_20, %c0_21], %20 {strides = array<i32>} : memref<1x128xf32, #tpu.memory_space<vmem>>, vector<1x128xf32>,
    } else {
    }
    %c0 = arith.constant 0 : index
    %c0_2 = arith.constant 0 : index
    %5 = vector.load %arg2[%c0, %c0_2] : memref<64x128xbf16, #tpu.memory_space<vmem>>, vector<64x128xbf16>
    %c0_3 = arith.constant 0 : index
    %c0_4 = arith.constant 0 : index
    %6 = vector.load %arg3[%c0_3, %c0_4] : memref<128x128xbf16, #tpu.memory_space<vmem>>, vector<128x128xbf16>
    %cst = arith.constant dense<0.000000e+00> : vector<64x128xf32>
    %7 = tpu.matmul %5, %6, %cst {dimension_numbers = #tpu.dot_dimension_numbers<[1], [0], [0], [1], [0, 0, 1, 1], [], []>} : vector<64x128xbf16>, vector<128x128xbf16>, vector<64x128xf32> -> vector<64x128xf32>
    %c0_i32_5 = arith.constant 0 : i32
    %8 = arith.cmpi eq, %arg0, %c0_i32_5 : i32
    %9 = arith.extui %8 : i1 to i32
    %cst_6 = arith.constant 5.000000e-03 : f32
    %c0_i32_7 = arith.constant 0 : i32
    %10 = arith.cmpi ne, %9, %c0_i32_7 : i32
    scf.if %10 {
      %c0_10 = arith.constant 0 : index
      %c0_11 = arith.constant 0 : index
      %14 = vector.load %arg12[%c0_10, %c0_11] : memref<1x128xf32, #tpu.memory_space<vmem>>, vector<1x128xf32>
      %cst_12 = arith.constant dense<0.000000e+00> : vector<128xf32>
      %15 = vector.multi_reduction <add>, %7, %cst_12 [0] : vector<64x128xf32> to vector<128xf32>
      %16 = vector.shape_cast %15 : vector<128xf32> to vector<1x128xf32>
      %17 = arith.addf %14, %16 : vector<1x128xf32>
      %c0_13 = arith.constant 0 : index
      %c0_14 = arith.constant 0 : index
      %18 = vector.load %arg12[%c0_13, %c0_14] : memref<1x128xf32, #tpu.memory_space<vmem>>, vector<1x128xf32>
      tpu.vector_store %arg12[%c0_13, %c0_14], %17 {strides = array<i32>} : memref<1x128xf32, #tpu.memory_space<vmem>>, vector<1x128xf32>,
      %c0_15 = arith.constant 0 : index
      %c0_16 = arith.constant 0 : index
      %19 = vector.load %arg13[%c0_15, %c0_16] : memref<1x128xf32, #tpu.memory_space<vmem>>, vector<1x128xf32>
      %20 = arith.mulf %7, %7 : vector<64x128xf32>
      %cst_17 = arith.constant dense<0.000000e+00> : vector<128xf32>
      %21 = vector.multi_reduction <add>, %20, %cst_17 [0] : vector<64x128xf32> to vector<128xf32>
      %22 = vector.shape_cast %21 : vector<128xf32> to vector<1x128xf32>
      %23 = arith.addf %19, %22 : vector<1x128xf32>
      %c0_18 = arith.constant 0 : index
      %c0_19 = arith.constant 0 : index
      %24 = vector.load %arg13[%c0_18, %c0_19] : memref<1x128xf32, #tpu.memory_space<vmem>>, vector<1x128xf32>
      tpu.vector_store %arg13[%c0_18, %c0_19], %23 {strides = array<i32>} : memref<1x128xf32, #tpu.memory_space<vmem>>, vector<1x128xf32>,
      %c3_i32 = arith.constant 3 : i32
      %25 = arith.cmpi eq, %arg1, %c3_i32 : i32
      %26 = arith.extui %25 : i1 to i32
      %c0_i32_20 = arith.constant 0 : i32
      %27 = arith.cmpi ne, %26, %c0_i32_20 : i32
      scf.if %27 {
        %c0_21 = arith.constant 0 : index
        %c0_22 = arith.constant 0 : index
        %28 = vector.load %arg12[%c0_21, %c0_22] : memref<1x128xf32, #tpu.memory_space<vmem>>, vector<1x128xf32>
        %29 = vector.broadcast %cst_6 : f32 to vector<1x128xf32>
        %30 = arith.mulf %28, %29 : vector<1x128xf32>
        %c0_23 = arith.constant 0 : index
        %c0_24 = arith.constant 0 : index
        %31 = vector.load %arg13[%c0_23, %c0_24] : memref<1x128xf32, #tpu.memory_space<vmem>>, vector<1x128xf32>
        %32 = vector.broadcast %cst_6 : f32 to vector<1x128xf32>
        %33 = arith.mulf %31, %32 : vector<1x128xf32>
        %34 = arith.mulf %30, %30 : vector<1x128xf32>
        %35 = arith.subf %33, %34 : vector<1x128xf32>
        %cst_25 = arith.constant 0.000000e+00 : f32
        %36 = vector.broadcast %cst_25 : f32 to vector<1x128xf32>
        %37 = arith.maximumf %35, %36 : vector<1x128xf32>
        %c0_26 = arith.constant 0 : index
        %c0_27 = arith.constant 0 : index
        %38 = vector.load %arg5[%c0_26, %c0_27] : memref<1x128xf32, #tpu.memory_space<vmem>>, vector<1x128xf32>
        %cst_28 = arith.constant 9.99999974E-6 : f32
        %39 = vector.broadcast %cst_28 : f32 to vector<1x128xf32>
        %40 = arith.addf %37, %39 : vector<1x128xf32>
        %41 = math.rsqrt %40 : vector<1x128xf32>
        %42 = arith.mulf %38, %41 : vector<1x128xf32>
        %c0_29 = arith.constant 0 : index
        %c0_30 = arith.constant 0 : index
        %43 = vector.load %arg14[%c0_29, %c0_30] : memref<1x128xf32, #tpu.memory_space<vmem>>, vector<1x128xf32>
        tpu.vector_store %arg14[%c0_29, %c0_30], %42 {strides = array<i32>} : memref<1x128xf32, #tpu.memory_space<vmem>>, vector<1x128xf32>,
        %c0_31 = arith.constant 0 : index
        %c0_32 = arith.constant 0 : index
        %44 = vector.load %arg6[%c0_31, %c0_32] : memref<1x128xf32, #tpu.memory_space<vmem>>, vector<1x128xf32>
        %45 = arith.mulf %30, %42 : vector<1x128xf32>
        %46 = arith.subf %44, %45 : vector<1x128xf32>
        %c0_33 = arith.constant 0 : index
        %c0_34 = arith.constant 0 : index
        %47 = vector.load %arg15[%c0_33, %c0_34] : memref<1x128xf32, #tpu.memory_space<vmem>>, vector<1x128xf32>
        tpu.vector_store %arg15[%c0_33, %c0_34], %46 {strides = array<i32>} : memref<1x128xf32, #tpu.memory_space<vmem>>, vector<1x128xf32>,
      } else {
      }
    } else {
    }
    %c1_i32 = arith.constant 1 : i32
    %11 = arith.cmpi eq, %arg0, %c1_i32 : i32
    %12 = arith.extui %11 : i1 to i32
    %cst_8 = arith.constant 5.000000e-03 : f32
    %c0_i32_9 = arith.constant 0 : i32
    %13 = arith.cmpi ne, %12, %c0_i32_9 : i32
    scf.if %13 {
      %c0_10 = arith.constant 0 : index
      %c0_11 = arith.constant 0 : index
      %14 = vector.load %arg14[%c0_10, %c0_11] : memref<1x128xf32, #tpu.memory_space<vmem>>, vector<1x128xf32>
      %15 = vector.broadcast %14 : vector<1x128xf32> to vector<64x128xf32>
      %16 = arith.mulf %7, %15 : vector<64x128xf32>
      %c0_12 = arith.constant 0 : index
      %c0_13 = arith.constant 0 : index
      %17 = vector.load %arg15[%c0_12, %c0_13] : memref<1x128xf32, #tpu.memory_space<vmem>>, vector<1x128xf32>
      %18 = vector.broadcast %17 : vector<1x128xf32> to vector<64x128xf32>
      %19 = arith.addf %16, %18 : vector<64x128xf32>
      %cst_14 = arith.constant 0.000000e+00 : f32
      %20 = vector.broadcast %cst_14 : f32 to vector<64x128xf32>
      %21 = arith.maximumf %19, %20 : vector<64x128xf32>
      %c64_i32 = arith.constant 64 : i32
      %22 = arith.muli %arg1, %c64_i32 : i32
      %23 = tpu.iota {dimensions = array<i32: 0>} : vector<64x1xi32>
      %24 = vector.broadcast %22 : i32 to vector<64x1xi32>
      %25 = arith.addi %24, %23 : vector<64x1xi32>
      %c200_i32 = arith.constant 200 : i32
      %26 = vector.broadcast %c200_i32 : i32 to vector<64x1xi32>
      %27 = arith.cmpi slt, %25, %26 : vector<64x1xi32>
      %cst_15 = arith.constant 0.000000e+00 : f32
      %28 = vector.shape_cast %27 : vector<64x1xi1> to vector<64x1xi1>
      %29 = vector.broadcast %28 : vector<64x1xi1> to vector<64x128xi1>
      %30 = vector.broadcast %cst_15 : f32 to vector<64x128xf32>
      %31 = arith.select %29, %21, %30 : vector<64x128xi1>, vector<64x128xf32>
      %32 = arith.truncf %31 : vector<64x128xf32> to vector<64x128xbf16>
      %c0_16 = arith.constant 0 : index
      %c0_17 = arith.constant 0 : index
      %33 = vector.load %arg4[%c0_16, %c0_17] : memref<128x128xbf16, #tpu.memory_space<vmem>>, vector<128x128xbf16>
      %cst_18 = arith.constant dense<0.000000e+00> : vector<64x128xf32>
      %34 = tpu.matmul %32, %33, %cst_18 {dimension_numbers = #tpu.dot_dimension_numbers<[1], [0], [0], [1], [0, 0, 1, 1], [], []>} : vector<64x128xbf16>, vector<128x128xbf16>, vector<64x128xf32> -> vector<64x128xf32>
      %c0_19 = arith.constant 0 : index
      %c0_20 = arith.constant 0 : index
      %35 = vector.load %arg9[%c0_19, %c0_20] : memref<64x128xf32, #tpu.memory_space<vmem>>, vector<64x128xf32>
      tpu.vector_store %arg9[%c0_19, %c0_20], %34 {strides = array<i32>} : memref<64x128xf32, #tpu.memory_space<vmem>>, vector<64x128xf32>,
      %c0_21 = arith.constant 0 : index
      %c0_22 = arith.constant 0 : index
      %36 = vector.load %arg16[%c0_21, %c0_22] : memref<1x128xf32, #tpu.memory_space<vmem>>, vector<1x128xf32>
      %cst_23 = arith.constant dense<0.000000e+00> : vector<128xf32>
      %37 = vector.multi_reduction <add>, %34, %cst_23 [0] : vector<64x128xf32> to vector<128xf32>
      %38 = vector.shape_cast %37 : vector<128xf32> to vector<1x128xf32>
      %39 = arith.addf %36, %38 : vector<1x128xf32>
      %c0_24 = arith.constant 0 : index
      %c0_25 = arith.constant 0 : index
      %40 = vector.load %arg16[%c0_24, %c0_25] : memref<1x128xf32, #tpu.memory_space<vmem>>, vector<1x128xf32>
      tpu.vector_store %arg16[%c0_24, %c0_25], %39 {strides = array<i32>} : memref<1x128xf32, #tpu.memory_space<vmem>>, vector<1x128xf32>,
      %c0_26 = arith.constant 0 : index
      %c0_27 = arith.constant 0 : index
      %41 = vector.load %arg17[%c0_26, %c0_27] : memref<1x128xf32, #tpu.memory_space<vmem>>, vector<1x128xf32>
      %42 = arith.mulf %34, %34 : vector<64x128xf32>
      %cst_28 = arith.constant dense<0.000000e+00> : vector<128xf32>
      %43 = vector.multi_reduction <add>, %42, %cst_28 [0] : vector<64x128xf32> to vector<128xf32>
      %44 = vector.shape_cast %43 : vector<128xf32> to vector<1x128xf32>
      %45 = arith.addf %41, %44 : vector<1x128xf32>
      %c0_29 = arith.constant 0 : index
      %c0_30 = arith.constant 0 : index
      %46 = vector.load %arg17[%c0_29, %c0_30] : memref<1x128xf32, #tpu.memory_space<vmem>>, vector<1x128xf32>
      tpu.vector_store %arg17[%c0_29, %c0_30], %45 {strides = array<i32>} : memref<1x128xf32, #tpu.memory_space<vmem>>, vector<1x128xf32>,
      %c3_i32 = arith.constant 3 : i32
      %47 = arith.cmpi eq, %arg1, %c3_i32 : i32
      %48 = arith.extui %47 : i1 to i32
      %c0_i32_31 = arith.constant 0 : i32
      %49 = arith.cmpi ne, %48, %c0_i32_31 : i32
      scf.if %49 {
        %c0_32 = arith.constant 0 : index
        %c0_33 = arith.constant 0 : index
        %50 = vector.load %arg16[%c0_32, %c0_33] : memref<1x128xf32, #tpu.memory_space<vmem>>, vector<1x128xf32>
        %51 = vector.broadcast %cst_8 : f32 to vector<1x128xf32>
        %52 = arith.mulf %50, %51 : vector<1x128xf32>
        %c0_34 = arith.constant 0 : index
        %c0_35 = arith.constant 0 : index
        %53 = vector.load %arg17[%c0_34, %c0_35] : memref<1x128xf32, #tpu.memory_space<vmem>>, vector<1x128xf32>
        %54 = vector.broadcast %cst_8 : f32 to vector<1x128xf32>
        %55 = arith.mulf %53, %54 : vector<1x128xf32>
        %56 = arith.mulf %52, %52 : vector<1x128xf32>
        %57 = arith.subf %55, %56 : vector<1x128xf32>
        %cst_36 = arith.constant 0.000000e+00 : f32
        %58 = vector.broadcast %cst_36 : f32 to vector<1x128xf32>
        %59 = arith.maximumf %57, %58 : vector<1x128xf32>
        %c0_37 = arith.constant 0 : index
        %c0_38 = arith.constant 0 : index
        %60 = vector.load %arg7[%c0_37, %c0_38] : memref<1x128xf32, #tpu.memory_space<vmem>>, vector<1x128xf32>
        %cst_39 = arith.constant 9.99999974E-6 : f32
        %61 = vector.broadcast %cst_39 : f32 to vector<1x128xf32>
        %62 = arith.addf %59, %61 : vector<1x128xf32>
        %63 = math.rsqrt %62 : vector<1x128xf32>
        %64 = arith.mulf %60, %63 : vector<1x128xf32>
        %c0_40 = arith.constant 0 : index
        %c0_41 = arith.constant 0 : index
        %65 = vector.load %arg10[%c0_40, %c0_41] : memref<1x128xf32, #tpu.memory_space<vmem>>, vector<1x128xf32>
        tpu.vector_store %arg10[%c0_40, %c0_41], %64 {strides = array<i32>} : memref<1x128xf32, #tpu.memory_space<vmem>>, vector<1x128xf32>,
        %c0_42 = arith.constant 0 : index
        %c0_43 = arith.constant 0 : index
        %66 = vector.load %arg8[%c0_42, %c0_43] : memref<1x128xf32, #tpu.memory_space<vmem>>, vector<1x128xf32>
        %67 = arith.mulf %52, %64 : vector<1x128xf32>
        %68 = arith.subf %66, %67 : vector<1x128xf32>
        %c0_44 = arith.constant 0 : index
        %c0_45 = arith.constant 0 : index
        %69 = vector.load %arg11[%c0_44, %c0_45] : memref<1x128xf32, #tpu.memory_space<vmem>>, vector<1x128xf32>
        tpu.vector_store %arg11[%c0_44, %c0_45], %68 {strides = array<i32>} : memref<1x128xf32, #tpu.memory_space<vmem>>, vector<1x128xf32>,
      } else {
      }
    } else {
    }
    return
  }
  func.func @transform_0(%arg0: i32, %arg1: i32) -> (i32, i32) {
    %c0_i32 = arith.constant 0 : i32
    %c0_i32_0 = arith.constant 0 : i32
    return %arg1, %c0_i32 : i32, i32
  }
  func.func @transform_1(%arg0: i32, %arg1: i32) -> (i32, i32) {
    %c0_i32 = arith.constant 0 : i32
    %c0_i32_0 = arith.constant 0 : i32
    %c0_i32_1 = arith.constant 0 : i32
    return %c0_i32, %c0_i32_0 : i32, i32
  }
  func.func @transform_2(%arg0: i32, %arg1: i32) -> (i32, i32) {
    %c0_i32 = arith.constant 0 : i32
    %c0_i32_0 = arith.constant 0 : i32
    %c0_i32_1 = arith.constant 0 : i32
    return %c0_i32, %c0_i32_0 : i32, i32
  }
  func.func @transform_3(%arg0: i32, %arg1: i32) -> (i32, i32) {
    %c0_i32 = arith.constant 0 : i32
    %c0_i32_0 = arith.constant 0 : i32
    %c0_i32_1 = arith.constant 0 : i32
    return %c0_i32, %c0_i32_0 : i32, i32
  }
  func.func @transform_4(%arg0: i32, %arg1: i32) -> (i32, i32) {
    %c0_i32 = arith.constant 0 : i32
    %c0_i32_0 = arith.constant 0 : i32
    %c0_i32_1 = arith.constant 0 : i32
    return %c0_i32, %c0_i32_0 : i32, i32
  }
  func.func @transform_5(%arg0: i32, %arg1: i32) -> (i32, i32) {
    %c0_i32 = arith.constant 0 : i32
    %c0_i32_0 = arith.constant 0 : i32
    %c0_i32_1 = arith.constant 0 : i32
    return %c0_i32, %c0_i32_0 : i32, i32
  }
  func.func @transform_6(%arg0: i32, %arg1: i32) -> (i32, i32) {
    %c0_i32 = arith.constant 0 : i32
    %c0_i32_0 = arith.constant 0 : i32
    %c0_i32_1 = arith.constant 0 : i32
    return %c0_i32, %c0_i32_0 : i32, i32
  }
  func.func @transform_7(%arg0: i32, %arg1: i32) -> (i32, i32) {
    %0 = arith.muli %arg0, %arg1 : i32
    %c0_i32 = arith.constant 0 : i32
    %c0_i32_0 = arith.constant 0 : i32
    return %0, %c0_i32 : i32, i32
  }
  func.func @transform_8(%arg0: i32, %arg1: i32) -> (i32, i32) {
    %c0_i32 = arith.constant 0 : i32
    %c0_i32_0 = arith.constant 0 : i32
    %c0_i32_1 = arith.constant 0 : i32
    return %c0_i32, %c0_i32_0 : i32, i32
  }
  func.func @transform_9(%arg0: i32, %arg1: i32) -> (i32, i32) {
    %c0_i32 = arith.constant 0 : i32
    %c0_i32_0 = arith.constant 0 : i32
    %c0_i32_1 = arith.constant 0 : i32
    return %c0_i32, %c0_i32_0 : i32, i32
  }
}

</mosaic_0001>

<bundles_post_ra>
// kernel: tpu_custom_call.1
= control target key start
LH: loop header
LB: loop body
LE: loop exit
PB: predicated region body
PF: predicated region fallthrough
CT: control target
= control target key end

     0   :  { %s2026_s0 = inlined_call_operand.hbm [shape: bf16[256,128], index: 0, kind: input, shape index: {}]   ;;  %s2027_s1 = inlined_call_operand.hbm [shape: bf16[128,128], index: 1, kind: input, shape index: {}]   ;;  %s2028_s2 = inlined_call_operand.hbm [shape: bf16[128,128], index: 2, kind: input, shape index: {}]   ;;  %s2029_s3 = inlined_call_operand.vmem [shape: f32[1,128], index: 3, kind: input, shape index: {}]   ;;  %s2030_s4 = inlined_call_operand.vmem [shape: f32[1,128], index: 4, kind: input, shape index: {}]   ;;  %s2031_s5 = inlined_call_operand.vmem [shape: f32[1,128], index: 5, kind: input, shape index: {}]   ;;  %s2032_s6 = inlined_call_operand.vmem [shape: f32[1,128], index: 6, kind: input, shape index: {}]   ;;  %s2033_s7 = inlined_call_operand.hbm [shape: f32[256,128], index: 7, kind: output, shape index: {0}]   ;;  %s2034_s8 = inlined_call_operand.hbm [shape: f32[1,128], index: 8, kind: output, shape index: {1}]   ;;  %s2035_s9 = inlined_call_operand.hbm [shape: f32[1,128], index: 9, kind: output, shape index: {2}]  }
   0x1   :  { %2048 = sst [smem:[#allocation29_spill]] %s2027_s1 }
   0x2   :  { %2049 = sst [smem:[#allocation30_spill]] %s2028_s2 }
   0x3   :  { %2050 = sst [smem:[#allocation31_spill]] %s2030_s4 }
   0x4   :  { %2051 = sst [smem:[#allocation32_spill]] %s2031_s5 }
   0x5   :  { %2052 = sst [smem:[#allocation33_spill]] %s2032_s6 }
   0x6   :  { %2053 = sst [smem:[#allocation34_spill]] %s2033_s7 }
   0x7   :  { %2054 = sst [smem:[#allocation35_spill]] %s2034_s8 }
   0x8   :  { %2055 = sst [smem:[#allocation36_spill]] %s2035_s9 }
   0x9   :  { %15 = vsyncpa [#allocation9], 0 }
   0xa   :  { %17 = vsyncpa [#allocation9 + $0x1], 0 }
   0xb   :  { %18 = vsyncpa [#allocation12], 0 }
   0xc   :  { %19 = vsyncpa [#allocation10], 0 }
   0xd   :  { %21 = vsyncpa [#allocation10 + $0x1], 0 }
   0xe   :  { %22 = vsyncpa [#allocation16], 0  ;;  %s1709_s30 = smov 0   ;;  %s1711_s10 = smov 0  }
   0xf   :  { %s1713_s11 = smov 0   ;;  %s1715_s12 = smov 0  }
  0x10   :  { %s1717_s13 = smov 0   ;;  %s1719_s14 = smov 0  }
  0x11   :  { %s1721_s15 = smov 0   ;;  %s1723_s16 = smov 0  }
  0x12   :  { %s1725_s17 = smov 0   ;;  %s1727_s18 = smov 0  }
  0x13   :  { %s1729_s19 = smov 0  }
  0x14 LB: > { %2056 = sst [smem:[#allocation22_spill]] %s1608_s30  ;;  %s1034_s20 = sadd.s32 4294967295, %s1648_s19   ;;  %s1648_s19 = sphi %s1729_s19, %s28_s19   ;;  %s1644_s18 = sphi %s1727_s18, %s2086_s18   ;;  %s1640_s17 = sphi %s1725_s17, %s2094_s17   ;;  %s1636_s16 = sphi %s1723_s16, %s2084_s16   ;;  %s1632_s15 = sphi %s1721_s15, %s2093_s15   ;;  %s1628_s14 = sphi %s1719_s14, %s2092_s14   ;;  %s1624_s13 = sphi %s1717_s13, %s2091_s13   ;;  %s1620_s12 = sphi %s1715_s12, %s2090_s12   ;;  %s1616_s11 = sphi %s1713_s11, %s2089_s11   ;;  %s1612_s10 = sphi %s1711_s10, %s2088_s10   ;;  %s1608_s30 = sphi %s1709_s30, %s2087_s30  }
  0x15   : > { %2057 = sst [smem:[#allocation23_spill]] %s1644_s18  ;;  %s1035_s21 = sadd.s32 4294967294, %s1648_s19  }
  0x16   : > { %p60_p0 = scmp.ne.s32.totalorder %s1624_s13, %s1620_s12  ;;  %p1765_p1 = scmp.eq.s32.totalorder %s1034_s20, 0 }
  0x17   : > { %p211_p2 = scmp.ne.s32.totalorder %s1616_s11, %s1612_s10  ;;  %p1771_p3 = scmp.eq.s32.totalorder %s1034_s20, 7 }
  0x18   : > { %p1777_p4 = por %p1765_p1, %p60_p0  ;;  %p217_p5 = scmp.ne.s32.totalorder %s1612_s10, %s1608_s30 }
  0x19   : > { %s2059_s23 = scalar_select %p1771_p3, 1, 0 }
  0x1a   : > { %p1785_p6 = por %p1771_p3, %p211_p2  ;;  %p218_p7 = scmp.eq.s32.totalorder %s1035_s21, 7 }
  0x1b   : > { %2060 = sst [smem:[#allocation24_spill]] %s2059_s23  ;;  %p1036_p8 = scmp.ge.s32.totalorder %s1648_s19, 1 }
  0x1c   : > { %s2062_s25 = scalar_select %p1785_p6, 1, 0 }
  0x1d   : > { %p267_p9 = scmp.lt.s32.totalorder %s1648_s19, 9  ;;  %p1791_p10 = por %p218_p7, %p217_p5 }
  0x1e   : > { %2063 = sst [smem:[#allocation25_spill]] %s2062_s25  ;;  %s1650_s20 = smov [#allocation11]  }
  0x1f   : > { %s2064_s26 = scalar_select %p1791_p10, 1, 0 }
  0x20   : > { %p1795_p11 = pnand %p1036_p8, %p267_p9  ;;  %s2067_s1 = sld [smem:[#allocation29_spill]] }
  0x21   : > { %2065 = sst [smem:[#allocation26_spill]] %s2064_s26  ;;  %s280_s21 = sshll.u32 %s1650_s20, 4  ;;  %s281_s21 = int_to_ptr.vmem [resolvable:$true] %s280_s21 }
  0x22   : > { %p1244_p12 = pneg %p1795_p11  ;;  %s2068_s2 = sld [smem:[#allocation30_spill]] }
  0x23   : > { %s2038_s29 = smov 64   ;;  %s1653_s20 = smov [#allocation13]  }
  0x24   : > { %p1245_p13 = pnand %p1244_p12, %p1765_p1  ;;  %s294_s9 = sshll.u32 %s1653_s20, 4  ;;  %s295_s9 = int_to_ptr.vmem [resolvable:$true] %s294_s9 }
  0x25   : > { %s37_s30 = sadd.s32 1, %s1640_s17  ;;  %s40_s26 = sadd.s32 1, %s1644_s18 }
  0x26   : > { %s278_s12 = sshll.u32 %s2067_s1, 4  ;;  %s2039_s1 = smov 4   ;;  %s279_s12 = int_to_ptr.hbm [resolvable:$true] %s278_s12 }
  0x27   : > { %1247 = dma.hbm_to_vmem [thread:$0]  (!%p1245_p13), %s279_s12, 1024, %s281_s21, [#allocation12], %s2038_s29, %s2038_s29, %s2039_s1  }
  0x28   : > { %s292_s28 = sshll.u32 %s2068_s2, 4  ;;  %p38_p0 = scmp.ge.s32.totalorder %s37_s30, 4  ;;  %s293_s28 = int_to_ptr.hbm [resolvable:$true] %s292_s28 }
  0x29   : > { %1250 = dma.hbm_to_vmem [thread:$0]  (!%p1245_p13), %s293_s28, 1024, %s295_s9, [#allocation12], %s2038_s29, %s2038_s29, %s2039_s1  }
  0x2a   : > { %s47_s2 = sadd.s32 1, %s1628_s14  ;;  %p54_p2 = scmp.ne.s32.totalorder %s1628_s14, %s1624_s13 }
  0x2b   : > { %s2096_s30 = smov (%p38_p0, %s37_s30), 0  ;;  %s2098_s26 = smov (!%p38_p0, %s40_s26), %s1644_s18 }
  0x2c   : > { %2069 = sst [smem:[#allocation27_spill]] %s2096_s30  ;;  %s44_s12 = ssub.s32 %s1640_s17, %s2096_s30 }
  0x2d   : > { %p55_p5 = scmp.eq.s32.totalorder %s1648_s19, 0  ;;  %p42_p7 = scmp.ge.s32.totalorder %s2098_s26, 2 }
  0x2e   : > { %p45_p8 = scmp.eq.s32.totalorder %s44_s12, 0  ;;  %s196_s21 = smul.u32 %s1640_s17, %s1644_s18 }
  0x2f   : > { %p1826_p9 = por %p55_p5, %p54_p2  ;;  %s2100_s26 = smov (%p42_p7, %s2098_s26), 0 }
  0x30   : > { %2071 = sst [smem:[#allocation28_spill]] %s2100_s26  ;;  %s197_s20 = smul.u32 %s2100_s26, %s2096_s30 }
  0x31   : > { %s1835_s28 = scalar_select %p45_p8, %s1628_s14, %s47_s2  }
  0x32   : > { %s201_s29 = sadd.s32 1, %s1616_s11  ;;  %p1261_p12 = scmp.lt.s32.totalorder %s1648_s19, 8 }
  0x33   : > { %s320_s1 = sand.u32 1, %s1628_s14   ;;  %s198_s7 = ssub.s32 %s196_s21, %s197_s20 }
  0x34   : > { %p199_p13 = scmp.eq.s32.totalorder %s198_s7, 0  ;;  %s1040_s25 = sshll.u32 %s320_s1, 5 }
  0x35   : > { %s1154_s12 = sshll.u32 %s1640_s17, 5  ;;  %s324_s5 = scalar_lea.vmem [#allocation8], %s1040_s25 }
  0x36   : > { %s1844_s8 = scalar_select %p199_p13, %s1616_s11, %s201_s29  }
  0x37   : > { %s329_s18 = scalar_lea.hbm %s2026_s0, %s1154_s12  ;;  %s332_s4 = sshll.u32 %s324_s5, 4  ;;  %s333_s4 = int_to_ptr.vmem [resolvable:$true] %s332_s4 }
  0x38   : > { %s330_s2 = sshll.u32 %s329_s18, 4  ;;  %p1252_p0 = pnand %p1261_p12, %p1826_p9  ;;  %s331_s2 = int_to_ptr.hbm [resolvable:$true] %s330_s2 }
  0x39   : > { %s321_s26 = scalar_lea.sflag [#allocation9], %s320_s1  ;;  %s2072_s30 = smov 4  }
  0x3a   : > { %s2073_s21 = smov 64   ;;  %344 = sbr.rel (%p1795_p11) target bundleno = 602 (0x25a), region = 48 }
  0x3b   : > { %1254 = dma.hbm_to_vmem [thread:$0]  (!%p1252_p0), %s331_s2, 512, %s333_s4, %s321_s26, %s2073_s21, %s2073_s21, %s2072_s30  }
  0x3c   : > { %s346_s6 = sand.u32 (!%p1795_p11), 1, %s1624_s13  }
  0x3d   : > { %s1044_s7 = sshll.u32 (!%p1795_p11), %s346_s6, 5  ;;  %s347_s23 = scalar_lea.sflag (!%p1795_p11), [#allocation9], %s346_s6 }
  0x3e   : > { %s1859_s5 = scalar_lea.vmem (!%p1795_p11), [#allocation8], %s1044_s7 }
  0x3f   : > { %1591 = dma.done.wait (%p1777_p4), %s347_s23, 512  }
  0x40   : > { %1593 = vsyncadd (%p1777_p4), %s347_s23, 4294966784 }
  0x41   : > { %1595 = dma.done.wait (%p1765_p1), [#allocation12], 2048  }
  0x42   : > { %1597 = vsyncadd (%p1765_p1), [#allocation12], 4294965248  ;;  %s389_s1 = sand.u32 1, %s1612_s10   ;;  %p399_p11 = scmp.eq.s32.totalorder %s1636_s16, 0 }
  0x43   : > { %s1047_s4 = sshll.u32 %s389_s1, 6  ;;  %p400_p2 = scmp.eq.s32.totalorder %s1632_s15, 0 }
  0x44   : > { %s1874_s18 = scalar_lea.vmem [#allocation14], %s1047_s4 }
  0x45   : > { %p401_p5 = pnand %p400_p2, %p399_p11 }
  0x47   : > { %404 = sbr.rel (%p401_p5) target bundleno = 81 (0x51), region = 64 }
  0x4c   : > { %v1654_v0 = vmov 0.0  }
  0x4d   : > { %405 = vst [vmem:[#allocation2] sm:$0x1] %v1654_v0 }
  0x4e   : > { %406 = vst [vmem:[#allocation3] sm:$0x1] %v1654_v0 }
  0x4f   : > { %407 = vst [vmem:[#allocation6] sm:$0x1] %v1654_v0 }
  0x50   : > { %408 = vst [vmem:[#allocation7] sm:$0x1] %v1654_v0 }
  0x51 PF: > { %v1166_v1 = vld [vmem:[#allocation11 + $0x38] sm:$0xff]  ;;  %v1165_v2 = vld [vmem:[#allocation11 + $0x30] sm:$0xff]  ;;  %v1164_v3 = vld [vmem:[#allocation11 + $0x28] sm:$0xff]  ;;  %p1096_p1 = scmp.ne.s32.totalorder %s1636_s16, 0 }
  0x52   : > { %505 = vmatpush.bf16.msra.mxu0 %v1166_v1  ;;  %1176 = vmatpush.bf16.msra.mxu1 %v1166_v1  ;;  %v1163_v4 = vld [vmem:[#allocation11 + $0x20] sm:$0xff]  ;;  %v1162_v5 = vld [vmem:[#allocation11 + $0x18] sm:$0xff]  ;;  %v1161_v6 = vld [vmem:[#allocation11 + $0x10] sm:$0xff]  ;;  %p1097_p4 = scmp.ne.s32.totalorder (!%p1096_p1), %s1632_s15, 3 }
  0x53   : > { %1177 = vmatpush.bf16.msra.mxu2 %v1166_v1  ;;  %1178 = vmatpush.bf16.msra.mxu3 %v1166_v1  ;;  %v1160_v7 = vld [vmem:[#allocation11 + $0x8] sm:$0xff]  ;;  %v1159_v8 = vld [vmem:[#allocation11] sm:$0xff]  ;;  %v1157_v11 = vld [vmem:[%s1859_s5 + $0x10] sm:$0xff] }
  0x54   : > { %v1155_v9 = vld [vmem:[%s1859_s5] sm:$0xff]  ;;  %v1156_v10 = vld [vmem:[%s1859_s5 + $0x8] sm:$0xff]  ;;  %v1158_v12 = vld [vmem:[%s1859_s5 + $0x18] sm:$0xff] }
  0x56   : > { %506 = vmatpush.bf16.msra.mxu0 %v1165_v2  ;;  %1179 = vmatpush.bf16.msra.mxu1 %v1165_v2 }
  0x57   : > { %1180 = vmatpush.bf16.msra.mxu2 %v1165_v2  ;;  %1181 = vmatpush.bf16.msra.mxu3 %v1165_v2 }
  0x5a   : > { %507 = vmatpush.bf16.msra.mxu0 %v1164_v3  ;;  %1182 = vmatpush.bf16.msra.mxu1 %v1164_v3 }
  0x5b   : > { %1183 = vmatpush.bf16.msra.mxu2 %v1164_v3  ;;  %1184 = vmatpush.bf16.msra.mxu3 %v1164_v3 }
  0x5e   : > { %508 = vmatpush.bf16.msra.mxu0 %v1163_v4  ;;  %1185 = vmatpush.bf16.msra.mxu1 %v1163_v4 }
  0x5f   : > { %1186 = vmatpush.bf16.msra.mxu2 %v1163_v4  ;;  %1187 = vmatpush.bf16.msra.mxu3 %v1163_v4 }
  0x62   : > { %509 = vmatpush.bf16.msra.mxu0 %v1162_v5  ;;  %1188 = vmatpush.bf16.msra.mxu1 %v1162_v5 }
  0x63   : > { %1189 = vmatpush.bf16.msra.mxu2 %v1162_v5  ;;  %1190 = vmatpush.bf16.msra.mxu3 %v1162_v5 }
  0x66   : > { %510 = vmatpush.bf16.msra.mxu0 %v1161_v6  ;;  %1191 = vmatpush.bf16.msra.mxu1 %v1161_v6 }
  0x67   : > { %1192 = vmatpush.bf16.msra.mxu2 %v1161_v6  ;;  %1193 = vmatpush.bf16.msra.mxu3 %v1161_v6 }
  0x6a   : > { %511 = vmatpush.bf16.msra.mxu0 %v1160_v7  ;;  %1194 = vmatpush.bf16.msra.mxu1 %v1160_v7 }
  0x6b   : > { %1195 = vmatpush.bf16.msra.mxu2 %v1160_v7  ;;  %1196 = vmatpush.bf16.msra.mxu3 %v1160_v7 }
  0x6e   : > { %512 = vmatpush.bf16.msra.mxu0 %v1159_v8  ;;  %1197 = vmatpush.bf16.msra.mxu1 %v1159_v8 }
  0x6f   : > { %1198 = vmatpush.bf16.msra.mxu2 %v1159_v8  ;;  %1199 = vmatpush.bf16.msra.mxu3 %v1159_v8 }
  0x71   : > { %513 = vmatmul.bf16.vlgmr.msra.gmra.mxu0 %v1155_v9  ;;  %518 = vmatmul.bf16.vlgmr.msra.gmra.mxu1 %v1156_v10 }
  0x72   : > { %523 = vmatmul.bf16.vlgmr.msra.gmra.mxu2 %v1157_v11  ;;  %528 = vmatmul.bf16.vlgmr.msra.gmra.mxu3 %v1158_v12 }
  0xee   : > { %v1880_v13 = vpop.f32.mrf.mxu0  ;;  %v1882_v14 = vpop.f32.mrf.mxu1 }
  0xf5   : > { %v1884_v15 = vpop.f32.mrf.mxu2  ;;  %v1886_v16 = vpop.f32.mrf.mxu3 }
  0xf6   : > { %v1888_v17 = vpop.f32.mrf.mxu0  ;;  %v1890_v18 = vpop.f32.mrf.mxu1 }
  0xf9   : > { %536 = sbr.rel (%p1096_p1) target bundleno = 325 (0x145), region = 68 }
  0xfd   : > { %v1892_v19 = vpop.f32.mrf.mxu2  ;;  %v1894_v20 = vpop.f32.mrf.mxu3 }
  0xfe   : > { %v538_v21 = vadd.f32 %v1888_v17, %v1880_v13  ;;  %v554_v22 = vmul.f32 %v1880_v13, %v1880_v13  ;;  %v555_v23 = vmul.f32 %v1888_v17, %v1888_v17  ;;  %v556_v24 = vmul.f32 %v1882_v14, %v1882_v14  ;;  %v537_v52 = vld [vmem:[#allocation2] sm:$0x1]  ;;  %v553_v55 = vld [vmem:[#allocation3] sm:$0x1]  ;;  %s2074_s29 = sld [smem:[#allocation31_spill]] (!%p1097_p4) }
  0xff   : > { %v557_v26 = vmul.f32 %v1890_v18, %v1890_v18  ;;  %v558_v29 = vmul.f32 %v1884_v15, %v1884_v15  ;;  %v559_v32 = vmul.f32 %v1892_v19, %v1892_v19  ;;  %v560_v35 = vmul.f32 %v1886_v16, %v1886_v16 }
 0x100   : > { %v539_v25 = vadd.f32 %v538_v21, %v1882_v14  ;;  %v562_v27 = vadd.f32 %v555_v23, %v554_v22  ;;  %v561_v38 = vmul.f32 %v1894_v20, %v1894_v20 }
 0x102   : > { %v540_v28 = vadd.f32 %v539_v25, %v1890_v18  ;;  %v563_v30 = vadd.f32 %v562_v27, %v556_v24 }
 0x104   : > { %v541_v31 = vadd.f32 %v540_v28, %v1884_v15  ;;  %v564_v33 = vadd.f32 %v563_v30, %v557_v26 }
 0x106   : > { %v542_v34 = vadd.f32 %v541_v31, %v1892_v19  ;;  %v565_v36 = vadd.f32 %v564_v33, %v558_v29 }
 0x108   : > { %v543_v37 = vadd.f32 %v542_v34, %v1886_v16  ;;  %v566_v39 = vadd.f32 %v565_v36, %v559_v32 }
 0x10a   : > { %v544_v40 = vadd.f32 %v543_v37, %v1894_v20  ;;  %v567_v41 = vadd.f32 %v566_v39, %v560_v35 }
 0x10c   : > { %v545_v42 = vrot.slane %v544_v40, 4  ;;  %v568_v43 = vadd.f32 %v567_v41, %v561_v38 }
 0x10e   : > { %v546_v44 = vadd.f32 %v545_v42, %v544_v40  ;;  %v569_v45 = vrot.slane %v568_v43, 4 }
 0x110   : > { %v547_v46 = vrot.slane %v546_v44, 2  ;;  %v570_v47 = vadd.f32 %v569_v45, %v568_v43 }
 0x112   : > { %v548_v48 = vadd.f32 %v547_v46, %v546_v44  ;;  %v571_v49 = vrot.slane %v570_v47, 2 }
 0x114   : > { %v549_v50 = vrot.slane %v548_v48, 1  ;;  %v572_v51 = vadd.f32 %v571_v49, %v570_v47 }
 0x116   : > { %v550_v53 = vadd.f32 %v549_v50, %v548_v48  ;;  %v573_v54 = vrot.slane %v572_v51, 1 }
 0x118   : > { %v551_v56 = vadd.f32 %v550_v53, %v537_v52  ;;  %v574_v57 = vadd.f32 %v573_v54, %v572_v51  ;;  %580 = sbr.rel (%p1097_p4) target bundleno = 325 (0x145), region = 72 }
 0x11a   : > { %552 = vst [vmem:[#allocation2] sm:$0x1] %v551_v56  ;;  %v575_v58 = vadd.f32 %v574_v57, %v553_v55 }
 0x11c   : > { %576 = vst [vmem:[#allocation3] sm:$0x1] %v575_v58 }
 0x11d   : > { %v588_v8 = vld [vmem:[%s2029_s3] sm:$0x1] }
 0x11e   : > { %v602_v12 = vld [vmem:[%s2074_s29] sm:$0x1] }
 0x121   : > { %v581_v59 = vld [vmem:[#allocation2] sm:$0x1] }
 0x122   : > { %v582_v61 = vmul.f32 0.005, %v581_v59 }
 0x123   : > { %v583_v60 = vld [vmem:[#allocation3] sm:$0x1] }
 0x124   : > { %v584_v62 = vmul.f32 0.005, %v583_v60  ;;  %v585_v63 = vmul.f32 %v582_v61, %v582_v61 }
 0x126   : > { %v586_v0 = vsub.f32 %v584_v62, %v585_v63 }
 0x128   : > { %v587_v1 = vmax.f32 %v586_v0, 0.0 }
 0x12a   : > { %v589_v2 = vadd.f32 1e-05, %v587_v1 }
 0x12c   : > { %1366 = vrsqrt.f32 %v589_v2  ;;  %vm596_vm0 = vweird.f32 %v589_v2 }
 0x132   : > { %v1367_v3 = vpop.eup %1366 }
 0x133   : > { %v591_v4 = vmul.f32 %v1367_v3, %v589_v2  ;;  %vm597_vm1 = vweird.f32 %v1367_v3 }
 0x134   : > { %vm598_vm2 = vmor %vm596_vm0, %vm597_vm1 }
 0x135   : > { %v592_v5 = vmul.f32 %v1367_v3, %v591_v4 }
 0x137   : > { %v593_v6 = vmul.f32 0.5, %v592_v5 }
 0x139   : > { %v594_v7 = vsub.f32 1.5, %v593_v6 }
 0x13b   : > { %v595_v9 = vmul.f32 %v1367_v3, %v594_v7 }
 0x13d   : > { %v599_v10 = vsel %vm598_vm2, %v1367_v3, %v595_v9 }
 0x13e   : > { %v600_v11 = vmul.f32 %v599_v10, %v588_v8 }
 0x140   : > { %601 = vst [vmem:[#allocation4] sm:$0x1] %v600_v11  ;;  %v603_v21 = vmul.f32 %v600_v11, %v582_v61 }
 0x142   : > { %v604_v22 = vsub.f32 %v602_v12, %v603_v21 }
 0x144   : > { %605 = vst [vmem:[#allocation5] sm:$0x1] %v604_v22 }
 0x145 PF: > { %p1098_p7 = scmp.ne.s32.totalorder %s1636_s16, 1 }
 0x146   : > { %s1099_s30 = sshll.u32 (!%p1098_p7), %s1632_s15, 6  ;;  %p1144_p8 = scmp.ne.s32.totalorder (!%p1098_p7), %s1632_s15, 3 }
 0x147   : > { %609 = sbr.rel (%p1098_p7) target bundleno = 569 (0x239), region = 76 }
 0x14c   : > { %v1174_v23 = vld [vmem:[#allocation13 + $0x38] sm:$0xff]  ;;  %v1173_v24 = vld [vmem:[#allocation13 + $0x30] sm:$0xff]  ;;  %v1172_v25 = vld [vmem:[#allocation13 + $0x28] sm:$0xff]  ;;  %v643_v26 = vlaneseq  ;;  %v652_v30 = vstv %s1099_s30  ;;  %s2075_s20 = sld [smem:[#allocation32_spill]] (!%p1144_p8) }
 0x14d   : > { %761 = vmatpush.bf16.msra.mxu0 %v1174_v23  ;;  %1200 = vmatpush.bf16.msra.mxu1 %v1174_v23  ;;  %v1171_v27 = vld [vmem:[#allocation13 + $0x20] sm:$0xff]  ;;  %v1368_v29 = vld [vmem:[#allocation4] ss:$0 sm:$0xff]  ;;  %v1369_v35 = vld [vmem:[#allocation5] ss:$0 sm:$0xff]  ;;  %s2076_s21 = sld [smem:[#allocation33_spill]] (!%p1144_p8) }
 0x14e   : > { %1201 = vmatpush.bf16.msra.mxu2 %v1174_v23  ;;  %1202 = vmatpush.bf16.msra.mxu3 %v1174_v23  ;;  %v644_v28 = vshrl.u32 %v643_v26, 7  ;;  %v1170_v31 = vld [vmem:[#allocation13 + $0x18] sm:$0xff]  ;;  %v614_v34 = vmul.f32 %v1368_v29, %v1880_v13  ;;  %v615_v38 = vmul.f32 %v1368_v29, %v1888_v17  ;;  %v616_v39 = vmul.f32 %v1368_v29, %v1882_v14  ;;  %v1169_v42 = vld [vmem:[#allocation13 + $0x10] sm:$0xff]  ;;  %v1167_v62 = vld [vmem:[#allocation13] sm:$0xff] }
 0x14f   : > { %v617_v40 = vmul.f32 %v1368_v29, %v1890_v18  ;;  %v618_v41 = vmul.f32 %v1368_v29, %v1884_v15  ;;  %v619_v43 = vmul.f32 %v1368_v29, %v1892_v19  ;;  %v620_v44 = vmul.f32 %v1368_v29, %v1886_v16  ;;  %v1168_v19 = vld [vmem:[#allocation13 + $0x8] sm:$0xff] }
 0x150   : > { %v645_v32 = vadd.s32 8, %v644_v28  ;;  %v646_v33 = vadd.s32 16, %v644_v28  ;;  %v653_v36 = vadd.s32 %v652_v30, %v644_v28  ;;  %v647_v37 = vadd.s32 24, %v644_v28 }
 0x151   : > { %762 = vmatpush.bf16.msra.mxu0 %v1173_v24  ;;  %1203 = vmatpush.bf16.msra.mxu1 %v1173_v24  ;;  %v621_v13 = vmul.f32 %v1368_v29, %v1894_v20  ;;  %v648_v17 = vadd.s32 32, %v644_v28  ;;  %v649_v47 = vadd.s32 40, %v644_v28  ;;  %v626_v14 = vadd.f32 %v1369_v35, %v614_v34 }
 0x152   : > { %1204 = vmatpush.bf16.msra.mxu2 %v1173_v24  ;;  %1205 = vmatpush.bf16.msra.mxu3 %v1173_v24  ;;  %v654_v45 = vadd.s32 %v652_v30, %v645_v32  ;;  %v655_v46 = vadd.s32 %v652_v30, %v646_v33  ;;  %v656_v48 = vadd.s32 %v652_v30, %v647_v37  ;;  %v650_v18 = vadd.s32 48, %v644_v28 }
 0x153   : > { %v651_v49 = vadd.s32 56, %v644_v28  ;;  %v627_v15 = vadd.f32 %v1369_v35, %v615_v38  ;;  %v628_v50 = vadd.f32 %v1369_v35, %v616_v39  ;;  %v629_v51 = vadd.f32 %v1369_v35, %v617_v40 }
 0x154   : > { %v630_v52 = vadd.f32 %v1369_v35, %v618_v41  ;;  %v631_v16 = vadd.f32 %v1369_v35, %v619_v43  ;;  %v632_v53 = vadd.f32 %v1369_v35, %v620_v44  ;;  %v633_v20 = vadd.f32 %v1369_v35, %v621_v13 }
 0x155   : > { %763 = vmatpush.bf16.msra.mxu0 %v1172_v25  ;;  %1206 = vmatpush.bf16.msra.mxu1 %v1172_v25  ;;  %vm661_vm3 = vcmp.lt.s32.totalorder %v653_v36, 200  ;;  %vm662_vm4 = vcmp.lt.s32.totalorder %v654_v45, 200  ;;  %v657_v54 = vadd.s32 %v652_v30, %v648_v17  ;;  %v658_v55 = vadd.s32 %v652_v30, %v649_v47 }
 0x156   : > { %1207 = vmatpush.bf16.msra.mxu2 %v1172_v25  ;;  %1208 = vmatpush.bf16.msra.mxu3 %v1172_v25  ;;  %vm663_vm5 = vcmp.lt.s32.totalorder %v655_v46, 200  ;;  %vm664_vm6 = vcmp.lt.s32.totalorder %v656_v48, 200  ;;  %v659_v56 = vadd.s32 %v652_v30, %v650_v18  ;;  %v660_v57 = vadd.s32 %v652_v30, %v651_v49  ;;  %vm1132_vm9 = vmpackc.low %vm662_vm4, %vm661_vm3 }
 0x157   : > { %v634_v58 = vmax.f32 %v626_v14, 0.0  ;;  %v635_v59 = vmax.f32 %v627_v15, 0.0  ;;  %v636_v60 = vmax.f32 %v628_v50, 0.0  ;;  %v637_v61 = vmax.f32 %v629_v51, 0.0  ;;  %vm1135_vm12 = vmpackc.low %vm664_vm6, %vm663_vm5  ;;  %v798_v15 = vld [vmem:[#allocation6] sm:$0x1] }
 0x158   : > { %v638_v63 = vmax.f32 %v630_v52, 0.0  ;;  %v639_v0 = vmax.f32 %v631_v16, 0.0  ;;  %v640_v1 = vmax.f32 %v632_v53, 0.0  ;;  %v641_v2 = vmax.f32 %v633_v20, 0.0  ;;  %v814_v52 = vld [vmem:[#allocation7] sm:$0x1] }
 0x159   : > { %764 = vmatpush.bf16.msra.mxu0 %v1171_v27  ;;  %1209 = vmatpush.bf16.msra.mxu1 %v1171_v27  ;;  %vm665_vm7 = vcmp.lt.s32.totalorder %v657_v54, 200  ;;  %vm666_vm8 = vcmp.lt.s32.totalorder %v658_v55, 200  ;;  %vm667_vm10 = vcmp.lt.s32.totalorder %v659_v56, 200  ;;  %vm668_vm11 = vcmp.lt.s32.totalorder %v660_v57, 200 }
 0x15a   : > { %1210 = vmatpush.bf16.msra.mxu2 %v1171_v27  ;;  %1211 = vmatpush.bf16.msra.mxu3 %v1171_v27  ;;  %v1133_v3 = vpack.c.bf16 %v635_v59, %v634_v58  ;;  %v1136_v4 = vpack.c.bf16 %v637_v61, %v636_v60  ;;  %vm1138_vm13 = vmpackc.low %vm666_vm8, %vm665_vm7  ;;  %v1139_v5 = vpack.c.bf16 %v639_v0, %v638_v63 }
 0x15b   : > { %v1142_v6 = vpack.c.bf16 %v641_v2, %v640_v1  ;;  %vm1141_vm14 = vmpackc.low %vm668_vm11, %vm667_vm10 }
 0x15d   : > { %765 = vmatpush.bf16.msra.mxu0 %v1170_v31  ;;  %1212 = vmatpush.bf16.msra.mxu1 %v1170_v31 }
 0x15e   : > { %1213 = vmatpush.bf16.msra.mxu2 %v1170_v31  ;;  %1214 = vmatpush.bf16.msra.mxu3 %v1170_v31 }
 0x161   : > { %766 = vmatpush.bf16.msra.mxu0 %v1169_v42  ;;  %1215 = vmatpush.bf16.msra.mxu1 %v1169_v42 }
 0x162   : > { %1216 = vmatpush.bf16.msra.mxu2 %v1169_v42  ;;  %1217 = vmatpush.bf16.msra.mxu3 %v1169_v42 }
 0x165   : > { %767 = vmatpush.bf16.msra.mxu0 %v1168_v19  ;;  %1218 = vmatpush.bf16.msra.mxu1 %v1168_v19 }
 0x166   : > { %1219 = vmatpush.bf16.msra.mxu2 %v1168_v19  ;;  %1220 = vmatpush.bf16.msra.mxu3 %v1168_v19 }
 0x169   : > { %768 = vmatpush.bf16.msra.mxu0 %v1167_v62  ;;  %1221 = vmatpush.bf16.msra.mxu1 %v1167_v62 }
 0x16a   : > { %1222 = vmatpush.bf16.msra.mxu2 %v1167_v62  ;;  %1223 = vmatpush.bf16.msra.mxu3 %v1167_v62 }
 0x16c   : > { %1134 = vmatmul.msk.bf16.vlgmr.msra.gmra.mxu0 %vm1132_vm9, %v1133_v3  ;;  %1137 = vmatmul.msk.bf16.vlgmr.msra.gmra.mxu1 %vm1135_vm12, %v1136_v4 }
 0x16d   : > { %1140 = vmatmul.msk.bf16.vlgmr.msra.gmra.mxu2 %vm1138_vm13, %v1139_v5  ;;  %1143 = vmatmul.msk.bf16.vlgmr.msra.gmra.mxu3 %vm1141_vm14, %v1142_v6 }
 0x1e9   : > { %v770_v7 = vpop.f32.mrf.mxu0  ;;  %v775_v8 = vpop.f32.mrf.mxu1 }
 0x1ea   : > { %790 = vst [vmem:[%s1874_s18] sm:$0xff] %v770_v7  ;;  %v815_v21 = vmul.f32 %v770_v7, %v770_v7  ;;  %v817_v24 = vmul.f32 %v775_v8, %v775_v8 }
 0x1eb   : > { %792 = vst [vmem:[%s1874_s18 + $0x10] sm:$0xff] %v775_v8 }
 0x1f0   : > { %v780_v9 = vpop.f32.mrf.mxu2  ;;  %v785_v10 = vpop.f32.mrf.mxu3 }
 0x1f1   : > { %794 = vst [vmem:[%s1874_s18 + $0x20] sm:$0xff] %v780_v9  ;;  %v772_v11 = vpop.f32.mrf.mxu0  ;;  %v777_v12 = vpop.f32.mrf.mxu1  ;;  %v819_v30 = vmul.f32 %v780_v9, %v780_v9  ;;  %v821_v38 = vmul.f32 %v785_v10, %v785_v10 }
 0x1f2   : > { %796 = vst [vmem:[%s1874_s18 + $0x30] sm:$0xff] %v785_v10  ;;  %v799_v22 = vadd.f32 %v772_v11, %v770_v7  ;;  %v816_v23 = vmul.f32 %v772_v11, %v772_v11  ;;  %v818_v28 = vmul.f32 %v777_v12, %v777_v12 }
 0x1f3   : > { %791 = vst [vmem:[%s1874_s18 + $0x8] sm:$0xff] %v772_v11 }
 0x1f4   : > { %v823_v25 = vadd.f32 %v816_v23, %v815_v21  ;;  %793 = vst [vmem:[%s1874_s18 + $0x18] sm:$0xff] %v777_v12  ;;  %v800_v26 = vadd.f32 %v799_v22, %v775_v8 }
 0x1f6   : > { %v801_v27 = vadd.f32 %v800_v26, %v777_v12  ;;  %v824_v29 = vadd.f32 %v823_v25, %v817_v24 }
 0x1f8   : > { %v825_v31 = vadd.f32 %v824_v29, %v818_v28  ;;  %v782_v32 = vpop.f32.mrf.mxu2  ;;  %v802_v33 = vadd.f32 %v801_v27, %v780_v9  ;;  %v787_v34 = vpop.f32.mrf.mxu3 }
 0x1f9   : > { %795 = vst [vmem:[%s1874_s18 + $0x28] sm:$0xff] %v782_v32  ;;  %v820_v36 = vmul.f32 %v782_v32, %v782_v32  ;;  %v822_v42 = vmul.f32 %v787_v34, %v787_v34 }
 0x1fa   : > { %v803_v35 = vadd.f32 %v802_v33, %v782_v32  ;;  %v826_v37 = vadd.f32 %v825_v31, %v819_v30  ;;  %797 = vst [vmem:[%s1874_s18 + $0x38] sm:$0xff] %v787_v34 }
 0x1fc   : > { %v827_v39 = vadd.f32 %v826_v37, %v820_v36  ;;  %v804_v40 = vadd.f32 %v803_v35, %v785_v10 }
 0x1fe   : > { %v805_v41 = vadd.f32 %v804_v40, %v787_v34  ;;  %v828_v43 = vadd.f32 %v827_v39, %v821_v38 }
 0x200   : > { %v806_v44 = vrot.slane %v805_v41, 4  ;;  %v829_v13 = vadd.f32 %v828_v43, %v822_v42 }
 0x202   : > { %v807_v45 = vadd.f32 %v806_v44, %v805_v41  ;;  %v830_v46 = vrot.slane %v829_v13, 4 }
 0x204   : > { %v808_v17 = vrot.slane %v807_v45, 2  ;;  %v831_v47 = vadd.f32 %v830_v46, %v829_v13 }
 0x206   : > { %v809_v14 = vadd.f32 %v808_v17, %v807_v45  ;;  %v832_v48 = vrot.slane %v831_v47, 2 }
 0x208   : > { %v810_v18 = vrot.slane %v809_v14, 1  ;;  %v833_v49 = vadd.f32 %v832_v48, %v831_v47 }
 0x20a   : > { %v811_v50 = vadd.f32 %v810_v18, %v809_v14  ;;  %v834_v51 = vrot.slane %v833_v49, 1 }
 0x20c   : > { %v812_v19 = vadd.f32 %v811_v50, %v798_v15  ;;  %v835_v16 = vadd.f32 %v834_v51, %v833_v49  ;;  %841 = sbr.rel (%p1144_p8) target bundleno = 569 (0x239), region = 80 }
 0x20e   : > { %813 = vst [vmem:[#allocation6] sm:$0x1] %v812_v19  ;;  %v836_v53 = vadd.f32 %v835_v16, %v814_v52 }
 0x210   : > { %837 = vst [vmem:[#allocation7] sm:$0x1] %v836_v53 }
 0x211   : > { %v849_v2 = vld [vmem:[%s2075_s20] sm:$0x1] }
 0x212   : > { %v863_v6 = vld [vmem:[%s2076_s21] sm:$0x1] }
 0x215   : > { %v842_v20 = vld [vmem:[#allocation6] sm:$0x1] }
 0x216   : > { %v843_v55 = vmul.f32 0.005, %v842_v20 }
 0x217   : > { %v844_v54 = vld [vmem:[#allocation7] sm:$0x1] }
 0x218   : > { %v845_v56 = vmul.f32 0.005, %v844_v54  ;;  %v846_v57 = vmul.f32 %v843_v55, %v843_v55 }
 0x21a   : > { %v847_v58 = vsub.f32 %v845_v56, %v846_v57 }
 0x21c   : > { %v848_v59 = vmax.f32 %v847_v58, 0.0 }
 0x21e   : > { %v850_v60 = vadd.f32 1e-05, %v848_v59 }
 0x220   : > { %1370 = vrsqrt.f32 %v850_v60  ;;  %vm857_vm15 = vweird.f32 %v850_v60 }
 0x226   : > { %v1371_v61 = vpop.eup %1370 }
 0x227   : > { %v852_v62 = vmul.f32 %v1371_v61, %v850_v60  ;;  %vm858_vm0 = vweird.f32 %v1371_v61 }
 0x228   : > { %vm859_vm1 = vmor %vm857_vm15, %vm858_vm0 }
 0x229   : > { %v853_v63 = vmul.f32 %v1371_v61, %v852_v62 }
 0x22b   : > { %v854_v0 = vmul.f32 0.5, %v853_v63 }
 0x22d   : > { %v855_v1 = vsub.f32 1.5, %v854_v0 }
 0x22f   : > { %v856_v3 = vmul.f32 %v1371_v61, %v855_v1 }
 0x231   : > { %v860_v4 = vsel %vm859_vm1, %v1371_v61, %v856_v3 }
 0x232   : > { %v861_v5 = vmul.f32 %v860_v4, %v849_v2 }
 0x234   : > { %862 = vst [vmem:[#allocation15] sm:$0x1] %v861_v5  ;;  %v864_v7 = vmul.f32 %v861_v5, %v843_v55 }
 0x236   : > { %v865_v8 = vsub.f32 %v863_v6, %v864_v7 }
 0x238   : > { %866 = vst [vmem:[#allocation17] sm:$0x1] %v865_v8 }
 0x239 PF: > { %s1655_s6 = smov [#allocation15]   ;;  %s2078_s22 = sld [smem:[#allocation35_spill]] }
 0x23a   : > { %s896_s23 = sshll.u32 %s1655_s6, 4  ;;  %s875_s27 = smul.u32 %s1632_s15, %s1636_s16  ;;  %s897_s23 = int_to_ptr.vmem [resolvable:$true] %s896_s23 }
 0x23b   : > { %s881_s29 = sshll.u32 %s1874_s18, 4  ;;  %s2080_s20 = sld [smem:[#allocation34_spill]]  ;;  %s882_s29 = int_to_ptr.vmem [resolvable:$true] %s881_s29 }
 0x23c   : > { %s1175_s30 = sshll.u32 %s875_s27, 6  ;;  %s1656_s21 = smov [#allocation17]  }
 0x23d   : > { %s908_s6 = sshll.u32 %s1656_s21, 4  ;;  %s868_s5 = scalar_lea.sflag [#allocation10], %s389_s1  ;;  %s909_s6 = int_to_ptr.vmem [resolvable:$true] %s908_s6 }
 0x23f   : > { %s898_s24 = sshll.u32 %s2078_s22, 4  ;;  %s899_s24 = int_to_ptr.hbm [resolvable:$true] %s898_s24 }
 0x240   : > { %1236 = dma.vmem_to_hbm [thread:$0]  (%p1771_p3), %s897_s23, 16, %s899_s24, [#allocation16]  }
 0x241   : > { %s880_s12 = scalar_lea.hbm %s2080_s20, %s1175_s30  ;;  %s1510_s18 = scalar_lea.hbm %s2080_s20, 256 }
 0x242   : > { %s883_s2 = sshll.u32 %s880_s12, 4  ;;  %s884_s2 = int_to_ptr.hbm [resolvable:$true] %s883_s2 }
 0x243   : > { %s1504_s4 = sshra.s32 %s884_s2, 4  ;;  %s1505_s4 = int_to_ptr.hbm [resolvable:$true] %s1504_s4 }
 0x244   : > { %s1506_s22 = scalar_lea.hbm %s1505_s4, 64  ;;  %p1511_p0 = scmp.lt.s32.totalorder %s1505_s4, %s2080_s20 }
 0x245   : > { %p1507_p9 = scmp.ne.s32.totalorder %s1505_s4, %s1506_s22  ;;  %p1512_p11 = scmp.lt.s32.totalorder %s1510_s18, %s1506_s22 }
 0x247   : > { %p1508_p12 = pnand %p1507_p9, %p1785_p6  ;;  %p1513_p2 = por %p1512_p11, %p1511_p0 }
 0x249   : > { %p1509_p13 = pneg %p1508_p12 }
 0x24b   : > { %p1514_p5 = pnand %p1513_p2, %p1509_p13 }
 0x24d   : > { %1517 = shalt.err (!%p1514_p5)
}
 0x24e   : > { %s1657_s1 = smov 128   ;;  %s1658_s27 = smov 8  }
 0x24f   : > { %1234 = dma.vmem_to_hbm [thread:$0]  (%p1785_p6), %s882_s29, 1024, %s884_s2, %s868_s5, %s1657_s1, %s1657_s1, %s1658_s27  }
 0x250   : > { %s2081_s9 = sld [smem:[#allocation36_spill]] }
 0x256   : > { %s910_s12 = sshll.u32 %s2081_s9, 4  ;;  %s911_s12 = int_to_ptr.hbm [resolvable:$true] %s910_s12 }
 0x257   : > { %1238 = dma.vmem_to_hbm [thread:$0]  (%p1771_p3), %s909_s6, 16, %s911_s12, [#allocation16]  }
 0x258   : > { %1599 = dma.done.wait (%p1771_p3), [#allocation16], 32  }
 0x259   : > { %1601 = vsyncadd (%p1771_p3), [#allocation16], 4294967264 }
 0x25a PF: > { %s2082_s21 = sld [smem:[#allocation22_spill]]  ;;  %p1268_p1 = scmp.ge.s32.totalorder %s1648_s19, 2 }
 0x25c   : > { %p1256_p6 = pnand %p1268_p1, %p1791_p10 }
 0x25e   : > { %p1257_p4 = pneg %p1256_p6 }
 0x260   : > { %s932_s25 = sand.u32 1, %s2082_s21  }
 0x261   : > { %s933_s29 = scalar_lea.sflag [#allocation10], %s932_s25 }
 0x262   : > { %1603 = dma.done.wait (%p1257_p4), %s933_s29, 1024  }
 0x263   : > { %1605 = vsyncadd (%p1257_p4), %s933_s29, 4294966272  ;;  %s28_s19 = sadd.s32 1, %s1648_s19   ;;  %s2084_s16 = sld [smem:[#allocation23_spill]] }
 0x264   : > { %p25_p7 = scmp.ge.s32.totalorder %s28_s19, 10   ;;  %s2085_s7 = sld [smem:[#allocation27_spill]] }
 0x265   : > { %s2086_s18 = sld [smem:[#allocation28_spill]]  ;;  %s2087_s30 = smov %s1612_s10 }
 0x266   : > { %s2088_s10 = smov %s1616_s11  ;;  %s2089_s11 = smov %s1844_s8 }
 0x267   : > { %s2090_s12 = smov %s1624_s13  ;;  %s2091_s13 = smov %s1628_s14 }
 0x268   : > { %s2092_s14 = smov %s1835_s28  ;;  %s2093_s15 = smov %s1640_s17 }
 0x269   :  { %27 = sbr.rel (!%p25_p7) target bundleno = 20 (0x14), region = 137 }
 0x26a   : > { %s2094_s17 = smov %s2085_s7 }
 0x26e   :  { %939 = vsyncpa [#allocation9], 1 }
 0x26f   :  { %941 = vsyncpa [#allocation9 + $0x1], 1 }
 0x270   :  { %942 = vsyncpa [#allocation12], 1 }
 0x271   :  { %943 = vsyncpa [#allocation10], 1 }
 0x272   :  { %945 = vsyncpa [#allocation10 + $0x1], 1 }
 0x273   :  { %946 = vsyncpa [#allocation16], 1 }

</bundles_post_ra>
